<compile_context>
chip_gen: v6e
topology: v6e:2x2x1
jax: 0.10.0
libtpu: 0.0.40
codegen_flags: <defaults>
</compile_context>

<pallas_src>
import functools

import jax
import jax.numpy as jnp
from jax.experimental import pallas as pl
from jax.experimental.pallas import tpu as pltpu

_INV_SQRT2 = 0.7071067811865476
_TM_CAP = 1024   # largest token tile we ever use
_TM_GOAL = 768   # above the HBM/MXU roofline crossover on every current gen


# --------------------------------------------------------------------------
# Kernel
# --------------------------------------------------------------------------
def swiglu_ff_kernel(x_ref, g_ref, wvg_ref, bvg_ref, wo_ref, bo_ref,
                     o_ref, xn_ref, acc_ref, *, ts, nsub, eps):
    # x_ref   : [tm, D]        token tile (resident across the n axis)
    # g_ref   : [1, D]         RMSNorm weight (resident)
    # wvg_ref : [D, 2*tn]      packed proj_in weights for this hidden tile
    #                          (per sub-chunk j: [val_j | gate_j], ts cols each)
    # bvg_ref : [nsc, 2*ts]    packed proj_in bias, fully resident
    # wo_ref  : [tn, D]        proj_out weight K-slice for this hidden tile
    # bo_ref  : [1, D]         proj_out bias (resident)
    # o_ref   : [tm, D]        output tile (written only at the last n step)
    # xn_ref  : [tm, D]        cached RMSNorm(x) in the matmul input dtype
    # acc_ref : [tm, D]        f32 accumulator for proj_out
    n = pl.program_id(1)

    @pl.when(n == 0)
    def _init():
        # RMSNorm once per token tile, math in f32, cache in input dtype so the
        # matmuls stay on the bf16 MXU path when inputs/weights are bf16.
        x = x_ref[...].astype(jnp.float32)
        ms = jnp.mean(x * x, axis=-1, keepdims=True)
        xn = x * jax.lax.rsqrt(ms + eps) * g_ref[...].astype(jnp.float32)
        xn_ref[...] = xn.astype(xn_ref.dtype)
        acc_ref[...] = jnp.zeros_like(acc_ref)

    xn = xn_ref[...]

    # Unrolled sub-chunk loop: one packed proj_in matmul + GELU gating +
    # proj_out accumulation per sub-chunk.  With nsub == 2 the VPU/EUP GELU of
    # chunk 0 overlaps the MXU work of chunk 1 (single basic block).
    for j in range(nsub):
        w_slab = wvg_ref[:, 2 * ts * j:2 * ts * (j + 1)]            # [D, 2*ts]
        vg = jnp.dot(xn, w_slab, preferred_element_type=jnp.float32)
        vg = vg + bvg_ref[pl.ds(n * nsub + j, 1), :].astype(jnp.float32)
        val = vg[:, :ts]
        gates = vg[:, ts:]
        # Exact (erf) GELU to match F.gelu default.
        gelu_g = 0.5 * gates * (1.0 + jax.lax.erf(gates * _INV_SQRT2))
        h = (val * gelu_g).astype(wo_ref.dtype)
        acc_ref[...] += jnp.dot(h, wo_ref[ts * j:ts * (j + 1), :],
                                preferred_element_type=jnp.float32)

    @pl.when(n == pl.num_programs(1) - 1)
    def _finalize():
        out = acc_ref[...] + bo_ref[...].astype(jnp.float32)
        o_ref[...] = out.astype(o_ref.dtype)


# --------------------------------------------------------------------------
# Tile planning (generation-aware via queried VMEM capacity)
# --------------------------------------------------------------------------
def _round_up(x, m):
    return ((x + m - 1) // m) * m


def _vmem_limit_bytes():
    # ~75% of physical VMEM: ~96 MiB on v5e/v6e (128 MiB), ~48 MiB on v7x (64 MiB).
    try:
        cap = int(pltpu.get_tpu_info().vmem_capacity_bytes)
    except Exception:
        cap = 64 << 20  # conservative fallback, safe on every generation
    return min(int(cap * 3 // 4), 110 << 20)


def _tm_budget(D, Hpad, tn, itemsize, vmem_limit):
    """Largest token tile (multiple of 8) whose VMEM footprint fits."""
    budget = max(vmem_limit - (6 << 20), 8 << 20)   # headroom for misc scratch
    # Double-buffered weight blocks + small resident vectors.
    fixed = (2 * (D * 2 * tn) + 2 * (tn * D) + 2 * (2 * Hpad) + 4 * D) * itemsize
    # Per token row: x (x2 buffers), out (x2), cached xn, f32 accumulator.
    per_row = D * (5 * itemsize + 4)
    return max(((budget - fixed) // per_row) // 8 * 8, 0)


def _plan_tiles(D, H, itemsize, vmem_limit):
    """Pick (tm_max, tn, Hpad, nsub).  Prefer tn multiples of 256 (2x256 MXU),
    and the largest tm up to _TM_GOAL so weight streaming is amortized."""
    cands = []
    for tn_pref in (512, 256):
        tn = min(tn_pref, _round_up(H, 128))
        Hpad = _round_up(H, tn)
        tm = min(_tm_budget(D, Hpad, tn, itemsize, vmem_limit), _TM_CAP)
        if tm >= 8:
            cands.append((min(tm, _TM_GOAL), tn, tm, Hpad))
    if not cands:
        # Extremely tight VMEM: fall back to a 128-wide hidden tile.
        tn = min(128, _round_up(H, 128))
        Hpad = _round_up(H, tn)
        tm = max(8, min(_tm_budget(D, Hpad, tn, itemsize, vmem_limit), _TM_CAP))
        cands.append((min(tm, _TM_GOAL), tn, tm, Hpad))
    _, tn, tm, Hpad = max(cands)
    nsub = 2 if tn >= 512 else 1
    return tm, tn, Hpad, nsub


def _pick_tm(M, tm_cap):
    """Pick tm <= tm_cap, preferring divisors of round_up(M, 8) so no big
    activation padding copy is needed."""
    Mp8 = _round_up(M, 8)
    tm_cap = max(8, (min(tm_cap, Mp8) // 8) * 8)
    lo = max(8, (tm_cap * 3 // 4) // 8 * 8)
    best = None
    for t in range(tm_cap, lo - 1, -8):
        if Mp8 % t == 0 and (best is None or t > best):
            best = t
            break
    if best is not None:
        return best, Mp8
    # No nearby divisor: pad tokens up to a multiple of tm_cap.
    return tm_cap, _round_up(M, tm_cap)


# --------------------------------------------------------------------------
# One-time parameter packing (no per-call weight slicing in the hot path)
# --------------------------------------------------------------------------
def pack_swiglu_params(params, *, tn=None, nsub=None):
    w_in = jnp.asarray(params["w_in"])          # [D, 2H]   (in, out) layout
    b_in = jnp.asarray(params["b_in"])          # [2H]
    w_out = jnp.asarray(params["w_out"])        # [H, D]
    b_out = jnp.asarray(params["b_out"])        # [D]
    g = jnp.asarray(params["norm_weight"])      # [D]

    D = w_in.shape[0]
    H = w_in.shape[1] // 2
    itemsize = jnp.dtype(w_in.dtype).itemsize
    vmem_limit = _vmem_limit_bytes()

    if tn is None:
        tm_max, tn, Hpad, nsub_auto = _plan_tiles(D, H, itemsize, vmem_limit)
    else:
        Hpad = _round_up(H, tn)
        tm_max = max(8, min(_tm_budget(D, Hpad, tn, itemsize, vmem_limit), _TM_CAP))
        nsub_auto = 2 if tn >= 512 else 1
    if nsub is None:
        nsub = nsub_auto
    ts = tn // nsub
    assert tn % 128 == 0 and tn % nsub == 0 and ts % 128 == 0

    nsc = Hpad // ts    # number of hidden sub-chunks

    def pad_h(a, axis):
        if Hpad == H:
            return a
        widths = [(0, 0)] * a.ndim
        widths[axis] = (0, Hpad - H)
        return jnp.pad(a, widths)   # zero padding => exactly zero contribution

    w_val = pad_h(w_in[:, :H], 1)                 # [D, Hpad]
    w_gate = pad_h(w_in[:, H:], 1)                # [D, Hpad]
    # Packed layout: per sub-chunk s, columns [val_s (ts) | gate_s (ts)].
    w_vg = jnp.concatenate(
        [w_val.reshape(D, nsc, ts), w_gate.reshape(D, nsc, ts)], axis=2
    ).reshape(D, 2 * Hpad)

    b_val = pad_h(b_in[:H], 0)
    b_gate = pad_h(b_in[H:], 0)
    b_vg = jnp.concatenate(
        [b_val.reshape(nsc, ts), b_gate.reshape(nsc, ts)], axis=1)   # [nsc, 2*ts]

    w_out_p = pad_h(w_out, 0)                     # [Hpad, D]

    return {
        "w_vg": w_vg,
        "b_vg": b_vg,
        "w_out": w_out_p,
        "b_out": b_out.reshape(1, D),
        "norm_weight": g.reshape(1, D),
        "meta": dict(D=D, H=H, Hpad=Hpad, tn=int(tn), ts=int(ts),
                     nsub=int(nsub), tm_max=int(tm_max),
                     vmem_limit=int(vmem_limit)),
    }


# --------------------------------------------------------------------------
# Forward wrapper
# --------------------------------------------------------------------------
def swiglu_feedforward(x, packed, *, tm=None):
    """x: [B, S, D] -> [B, S, D].  `packed` comes from pack_swiglu_params."""
    meta = packed["meta"]
    D, Hpad, tn, ts, nsub = meta["D"], meta["Hpad"], meta["tn"], meta["ts"], meta["nsub"]

    B, S, Dx = x.shape
    assert Dx == D
    M = B * S
    x2 = x.reshape(M, D)

    tm_cap = tm if tm is not None else meta["tm_max"]
    tm, Mp = _pick_tm(M, tm_cap)
    if Mp != M:
        x2 = jnp.pad(x2, ((0, Mp - M), (0, 0)))

    grid = (Mp // tm, Hpad // tn)
    nsc = Hpad // ts
    # PyTorch nn.RMSNorm(eps=None) uses torch.finfo(input.dtype).eps.
    eps = float(jnp.finfo(x.dtype).eps)

    kernel = functools.partial(swiglu_ff_kernel, ts=ts, nsub=nsub, eps=eps)

    out2 = pl.pallas_call(
        kernel,
        out_shape=jax.ShapeDtypeStruct((Mp, D), x.dtype),
        grid=grid,
        in_specs=[
            pl.BlockSpec((tm, D), lambda i, n: (i, 0)),          # x (resident over n)
            pl.BlockSpec((1, D), lambda i, n: (0, 0)),           # norm weight
            pl.BlockSpec((D, 2 * tn), lambda i, n: (0, n)),      # packed w_in tile
            pl.BlockSpec((nsc, 2 * ts), lambda i, n: (0, 0)),    # packed b_in (resident)
            pl.BlockSpec((tn, D), lambda i, n: (n, 0)),          # w_out K-slice
            pl.BlockSpec((1, D), lambda i, n: (0, 0)),           # b_out
        ],
        out_specs=pl.BlockSpec((tm, D), lambda i, n: (i, 0)),
        scratch_shapes=[
            pltpu.VMEM((tm, D), x.dtype),       # cached RMSNorm(x)
            pltpu.VMEM((tm, D), jnp.float32),   # proj_out accumulator
        ],
        compiler_params=pltpu.CompilerParams(
            dimension_semantics=("parallel", "arbitrary"),
            vmem_limit_bytes=meta["vmem_limit"],
        ),
    )(x2, packed["norm_weight"], packed["w_vg"], packed["b_vg"],
      packed["w_out"], packed["b_out"])

    return out2[:M].reshape(B, S, D)


# --------------------------------------------------------------------------
# Parameter init (matches torch Linear / RMSNorm defaults) and reference
# --------------------------------------------------------------------------
def init_params(key, dim, expand_factor=4.0):
    dim_hidden = int(dim * expand_factor * 2 / 3)
    k1, k2, k3, k4 = jax.random.split(key, 4)
    bound_in = 1.0 / (dim ** 0.5)
    bound_out = 1.0 / (dim_hidden ** 0.5)
    return {
        "norm_weight": jnp.ones((dim,), jnp.float32),
        # Linear(dim, 2*dim_hidden): torch stores [out, in]; we keep [in, out]
        "w_in": jax.random.uniform(k1, (dim, 2 * dim_hidden), jnp.float32,
                                   -bound_in, bound_in),
        "b_in": jax.random.uniform(k2, (2 * dim_hidden,), jnp.float32,
                                   -bound_in, bound_in),
        "w_out": jax.random.uniform(k3, (dim_hidden, dim), jnp.float32,
                                    -bound_out, bound_out),
        "b_out": jax.random.uniform(k4, (dim,), jnp.float32,
                                    -bound_out, bound_out),
    }


def _reference(x, params):
    eps = float(jnp.finfo(x.dtype).eps)
    xf = x.astype(jnp.float32)
    ms = jnp.mean(xf * xf, axis=-1, keepdims=True)
    xn = xf * jax.lax.rsqrt(ms + eps) * params["norm_weight"].astype(jnp.float32)
    proj = xn @ params["w_in"].astype(jnp.float32) + params["b_in"].astype(jnp.float32)
    H = proj.shape[-1] // 2
    val, gates = proj[..., :H], proj[..., H:]
    h = val * (0.5 * gates * (1.0 + jax.lax.erf(gates * _INV_SQRT2)))
    return h @ params["w_out"].astype(jnp.float32) + params["b_out"].astype(jnp.float32)


if __name__ == "__main__":
    key = jax.random.PRNGKey(0)
    kx, kp = jax.random.split(key)

    # Small but awkward shapes: M = 46 (ragged), D = 96 -> dim_hidden = 256.
    B, S, D = 2, 23, 96
    x = jax.random.normal(kx, (B, S, D), jnp.float32)
    params = init_params(kp, D)
    ref = _reference(x, params)

    # 1) Multi-tile path: 2 hidden tiles, 3 token tiles, pl.when init/finalize,
    #    ragged-M handling (46 -> 48 rows).
    packed_a = pack_swiglu_params(params, tn=128, nsub=1)
    out_a = jax.block_until_ready(swiglu_feedforward(x, packed_a, tm=16))
    assert out_a.shape == (B, S, D)
    assert jnp.allclose(out_a, ref, atol=2e-3, rtol=2e-3), \
        float(jnp.max(jnp.abs(out_a - ref)))

    # 2) Sub-chunked path: one hidden tile split into 2 sub-chunks (packed
    #    val/gate slabs + in-kernel bias row indexing), 2 token tiles.
    packed_b = pack_swiglu_params(params, tn=256, nsub=2)
    out_b = jax.block_until_ready(swiglu_feedforward(x, packed_b, tm=24))
    assert jnp.allclose(out_b, ref, atol=2e-3, rtol=2e-3), \
        float(jnp.max(jnp.abs(out_b - ref)))

    # 3) Default auto-planned tiling (generation-aware VMEM budget), f32.
    packed_c = pack_swiglu_params(params)
    out_c = jax.block_until_ready(swiglu_feedforward(x, packed_c))
    assert jnp.allclose(out_c, ref, atol=2e-3, rtol=2e-3), \
        float(jnp.max(jnp.abs(out_c - ref)))

    # 4) Production dtype path: bf16 operands -> bf16 MXU with f32 accumulation
    #    (and bf16 RMSNorm eps for PyTorch parity).
    x_bf = x.astype(jnp.bfloat16)
    params_bf = jax.tree_util.tree_map(lambda p: p.astype(jnp.bfloat16), params)
    packed_bf = pack_swiglu_params(params_bf)
    out_bf = jax.block_until_ready(swiglu_feedforward(x_bf, packed_bf))
    assert out_bf.shape == (B, S, D) and out_bf.dtype == jnp.bfloat16
    assert bool(jnp.all(jnp.isfinite(out_bf.astype(jnp.float32))))

    print("KERNEL_OK")
</pallas_src>

<mosaic_0001>
module attributes {stable_mosaic.version = 11 : i64} {
  func.func @swiglu_ff_kernel(%arg0: i32, %arg1: i32, %arg2: memref<16x96xf32, #tpu.memory_space<vmem>>, %arg3: memref<1x96xf32, #tpu.memory_space<vmem>>, %arg4: memref<96x256xf32, #tpu.memory_space<vmem>>, %arg5: memref<2x256xf32, #tpu.memory_space<vmem>>, %arg6: memref<128x96xf32, #tpu.memory_space<vmem>>, %arg7: memref<1x96xf32, #tpu.memory_space<vmem>>, %arg8: memref<16x96xf32, #tpu.memory_space<vmem>>, %arg9: memref<16x96xf32, #tpu.memory_space<vmem>>, %arg10: memref<16x96xf32, #tpu.memory_space<vmem>>) attributes {dimension_semantics = [#tpu.dimension_semantics<parallel>, #tpu.dimension_semantics<arbitrary>], iteration_bounds = array<i64: 3, 2>, scalar_prefetch = 0 : i64, scratch_operands = 2 : i64, tpu.core_type = #tpu.core_type<tc>, window_params = [{transform_indices = @transform_0, window_bounds = array<i64: 16, 96>}, {pipeline_mode = #tpu.pipeline_mode<synchronous>, transform_indices = @transform_1, window_bounds = array<i64: 1, 96>}, {transform_indices = @transform_2, window_bounds = array<i64: 96, 256>}, {pipeline_mode = #tpu.pipeline_mode<synchronous>, transform_indices = @transform_3, window_bounds = array<i64: 2, 256>}, {transform_indices = @transform_4, window_bounds = array<i64: 128, 96>}, {pipeline_mode = #tpu.pipeline_mode<synchronous>, transform_indices = @transform_5, window_bounds = array<i64: 1, 96>}, {transform_indices = @transform_6, window_bounds = array<i64: 16, 96>}]} {
    %c0_i32 = arith.constant 0 : i32
    %0 = arith.cmpi eq, %arg1, %c0_i32 : i32
    %1 = arith.extui %0 : i1 to i32
    %c0_i32_0 = arith.constant 0 : i32
    %2 = arith.cmpi ne, %1, %c0_i32_0 : i32
    scf.if %2 {
      %c0_18 = arith.constant 0 : index
      %c0_19 = arith.constant 0 : index
      %31 = vector.load %arg2[%c0_18, %c0_19] : memref<16x96xf32, #tpu.memory_space<vmem>>, vector<16x96xf32>
      %32 = arith.mulf %31, %31 : vector<16x96xf32>
      %cst_20 = arith.constant dense<0.000000e+00> : vector<16xf32>
      %33 = vector.multi_reduction <add>, %32, %cst_20 [1] : vector<16x96xf32> to vector<16xf32>
      %34 = vector.shape_cast %33 : vector<16xf32> to vector<16x1xf32>
      %cst_21 = arith.constant 9.600000e+01 : f32
      %35 = vector.broadcast %cst_21 : f32 to vector<16x1xf32>
      %36 = arith.divf %34, %35 : vector<16x1xf32>
      %cst_22 = arith.constant 1.1920929E-7 : f32
      %37 = vector.broadcast %cst_22 : f32 to vector<16x1xf32>
      %38 = arith.addf %36, %37 : vector<16x1xf32>
      %39 = math.rsqrt %38 : vector<16x1xf32>
      %40 = vector.broadcast %39 : vector<16x1xf32> to vector<16x96xf32>
      %41 = arith.mulf %31, %40 : vector<16x96xf32>
      %c0_23 = arith.constant 0 : index
      %c0_24 = arith.constant 0 : index
      %42 = vector.load %arg3[%c0_23, %c0_24] : memref<1x96xf32, #tpu.memory_space<vmem>>, vector<1x96xf32>
      %43 = vector.broadcast %42 : vector<1x96xf32> to vector<16x96xf32>
      %44 = arith.mulf %41, %43 : vector<16x96xf32>
      %c0_25 = arith.constant 0 : index
      %c0_26 = arith.constant 0 : index
      %45 = vector.load %arg9[%c0_25, %c0_26] : memref<16x96xf32, #tpu.memory_space<vmem>>, vector<16x96xf32>
      tpu.vector_store %arg9[%c0_25, %c0_26], %44 {strides = array<i32>} : memref<16x96xf32, #tpu.memory_space<vmem>>, vector<16x96xf32>,
      %cst_27 = arith.constant 0.000000e+00 : f32
      %46 = vector.broadcast %cst_27 : f32 to vector<16x96xf32>
      %c0_28 = arith.constant 0 : index
      %c0_29 = arith.constant 0 : index
      %47 = vector.load %arg10[%c0_28, %c0_29] : memref<16x96xf32, #tpu.memory_space<vmem>>, vector<16x96xf32>
      tpu.vector_store %arg10[%c0_28, %c0_29], %46 {strides = array<i32>} : memref<16x96xf32, #tpu.memory_space<vmem>>, vector<16x96xf32>,
    } else {
    }
    %c0 = arith.constant 0 : index
    %c0_1 = arith.constant 0 : index
    %3 = vector.load %arg9[%c0, %c0_1] : memref<16x96xf32, #tpu.memory_space<vmem>>, vector<16x96xf32>
    %c0_2 = arith.constant 0 : index
    %c0_3 = arith.constant 0 : index
    %4 = vector.load %arg4[%c0_2, %c0_3] : memref<96x256xf32, #tpu.memory_space<vmem>>, vector<96x256xf32>
    %cst = arith.constant dense<0.000000e+00> : vector<16x256xf32>
    %5 = tpu.matmul %3, %4, %cst {dimension_numbers = #tpu.dot_dimension_numbers<[1], [0], [0], [1], [0, 0, 1, 1], [], []>} : vector<16x96xf32>, vector<96x256xf32>, vector<16x256xf32> -> vector<16x256xf32>
    %c1_i32 = arith.constant 1 : i32
    %6 = arith.muli %arg1, %c1_i32 : i32
    %c0_i32_4 = arith.constant 0 : i32
    %7 = arith.addi %6, %c0_i32_4 : i32
    %8 = arith.index_cast %7 : i32 to index
    %c0_5 = arith.constant 0 : index
    %9 = vector.load %arg5[%8, %c0_5] : memref<2x256xf32, #tpu.memory_space<vmem>>, vector<1x256xf32>
    %10 = vector.broadcast %9 : vector<1x256xf32> to vector<16x256xf32>
    %11 = arith.addf %5, %10 : vector<16x256xf32>
    %12 = vector.extract_strided_slice %11 {offsets = [0, 0], sizes = [16, 128], strides = [1, 1]} : vector<16x256xf32> to vector<16x128xf32>
    %13 = vector.extract_strided_slice %11 {offsets = [0, 128], sizes = [16, 128], strides = [1, 1]} : vector<16x256xf32> to vector<16x128xf32>
    %cst_6 = arith.constant 5.000000e-01 : f32
    %14 = vector.broadcast %cst_6 : f32 to vector<16x128xf32>
    %15 = arith.mulf %14, %13 : vector<16x128xf32>
    %cst_7 = arith.constant 0.707106769 : f32
    %16 = vector.broadcast %cst_7 : f32 to vector<16x128xf32>
    %17 = arith.mulf %13, %16 : vector<16x128xf32>
    %18 = math.erf %17 : vector<16x128xf32>
    %cst_8 = arith.constant 1.000000e+00 : f32
    %19 = vector.broadcast %cst_8 : f32 to vector<16x128xf32>
    %20 = arith.addf %19, %18 : vector<16x128xf32>
    %21 = arith.mulf %15, %20 : vector<16x128xf32>
    %22 = arith.mulf %12, %21 : vector<16x128xf32>
    %c0_9 = arith.constant 0 : index
    %c0_10 = arith.constant 0 : index
    %23 = vector.load %arg10[%c0_9, %c0_10] : memref<16x96xf32, #tpu.memory_space<vmem>>, vector<16x96xf32>
    %c0_11 = arith.constant 0 : index
    %c0_12 = arith.constant 0 : index
    %24 = vector.load %arg6[%c0_11, %c0_12] : memref<128x96xf32, #tpu.memory_space<vmem>>, vector<128x96xf32>
    %cst_13 = arith.constant dense<0.000000e+00> : vector<16x96xf32>
    %25 = tpu.matmul %22, %24, %cst_13 {dimension_numbers = #tpu.dot_dimension_numbers<[1], [0], [0], [1], [0, 0, 1, 1], [], []>} : vector<16x128xf32>, vector<128x96xf32>, vector<16x96xf32> -> vector<16x96xf32>
    %26 = arith.addf %23, %25 : vector<16x96xf32>
    %c0_14 = arith.constant 0 : index
    %c0_15 = arith.constant 0 : index
    %27 = vector.load %arg10[%c0_14, %c0_15] : memref<16x96xf32, #tpu.memory_space<vmem>>, vector<16x96xf32>
    tpu.vector_store %arg10[%c0_14, %c0_15], %26 {strides = array<i32>} : memref<16x96xf32, #tpu.memory_space<vmem>>, vector<16x96xf32>,
    %c1_i32_16 = arith.constant 1 : i32
    %28 = arith.cmpi eq, %arg1, %c1_i32_16 : i32
    %29 = arith.extui %28 : i1 to i32
    %c0_i32_17 = arith.constant 0 : i32
    %30 = arith.cmpi ne, %29, %c0_i32_17 : i32
    scf.if %30 {
      %c0_18 = arith.constant 0 : index
      %c0_19 = arith.constant 0 : index
      %31 = vector.load %arg10[%c0_18, %c0_19] : memref<16x96xf32, #tpu.memory_space<vmem>>, vector<16x96xf32>
      %c0_20 = arith.constant 0 : index
      %c0_21 = arith.constant 0 : index
      %32 = vector.load %arg7[%c0_20, %c0_21] : memref<1x96xf32, #tpu.memory_space<vmem>>, vector<1x96xf32>
      %33 = vector.broadcast %32 : vector<1x96xf32> to vector<16x96xf32>
      %34 = arith.addf %31, %33 : vector<16x96xf32>
      %c0_22 = arith.constant 0 : index
      %c0_23 = arith.constant 0 : index
      %35 = vector.load %arg8[%c0_22, %c0_23] : memref<16x96xf32, #tpu.memory_space<vmem>>, vector<16x96xf32>
      tpu.vector_store %arg8[%c0_22, %c0_23], %34 {strides = array<i32>} : memref<16x96xf32, #tpu.memory_space<vmem>>, vector<16x96xf32>,
    } else {
    }
    return
  }
  func.func @transform_0(%arg0: i32, %arg1: i32) -> (i32, i32) {
    %c0_i32 = arith.constant 0 : i32
    %c0_i32_0 = arith.constant 0 : i32
    return %arg0, %c0_i32 : i32, i32
  }
  func.func @transform_1(%arg0: i32, %arg1: i32) -> (i32, i32) {
    %c0_i32 = arith.constant 0 : i32
    %c0_i32_0 = arith.constant 0 : i32
    %c0_i32_1 = arith.constant 0 : i32
    return %c0_i32, %c0_i32_0 : i32, i32
  }
  func.func @transform_2(%arg0: i32, %arg1: i32) -> (i32, i32) {
    %c0_i32 = arith.constant 0 : i32
    %c0_i32_0 = arith.constant 0 : i32
    return %c0_i32, %arg1 : i32, i32
  }
  func.func @transform_3(%arg0: i32, %arg1: i32) -> (i32, i32) {
    %c0_i32 = arith.constant 0 : i32
    %c0_i32_0 = arith.constant 0 : i32
    %c0_i32_1 = arith.constant 0 : i32
    return %c0_i32, %c0_i32_0 : i32, i32
  }
  func.func @transform_4(%arg0: i32, %arg1: i32) -> (i32, i32) {
    %c0_i32 = arith.constant 0 : i32
    %c0_i32_0 = arith.constant 0 : i32
    return %arg1, %c0_i32 : i32, i32
  }
  func.func @transform_5(%arg0: i32, %arg1: i32) -> (i32, i32) {
    %c0_i32 = arith.constant 0 : i32
    %c0_i32_0 = arith.constant 0 : i32
    %c0_i32_1 = arith.constant 0 : i32
    return %c0_i32, %c0_i32_0 : i32, i32
  }
  func.func @transform_6(%arg0: i32, %arg1: i32) -> (i32, i32) {
    %c0_i32 = arith.constant 0 : i32
    %c0_i32_0 = arith.constant 0 : i32
    return %arg0, %c0_i32 : i32, i32
  }
}

</mosaic_0001>

<bundles_post_ra>
// kernel: tpu_custom_call.1
= control target key start
LH: loop header
LB: loop body
LE: loop exit
PB: predicated region body
PF: predicated region fallthrough
CT: control target
= control target key end

     0   :  { %s1424_s0 = inlined_call_operand.vmem [shape: f32[48,96], index: 0, kind: input, shape index: {}]   ;;  %s1425_s1 = inlined_call_operand.vmem [shape: f32[1,96], index: 1, kind: input, shape index: {}]   ;;  %s1426_s2 = inlined_call_operand.vmem [shape: f32[96,512], index: 2, kind: input, shape index: {}]   ;;  %s1427_s3 = inlined_call_operand.vmem [shape: f32[2,256], index: 3, kind: input, shape index: {}]   ;;  %s1428_s4 = inlined_call_operand.vmem [shape: f32[256,96], index: 4, kind: input, shape index: {}]   ;;  %s1429_s5 = inlined_call_operand.vmem [shape: f32[1,96], index: 5, kind: input, shape index: {}]   ;;  %s1430_s6 = inlined_call_operand.hbm [shape: f32[48,96], index: 6, kind: output, shape index: {}]  }
   0x1   :  { %1436 = sst [smem:[#allocation12_spill]] %s1426_s2 }
   0x2   :  { %11 = vsyncpa [#allocation6], 0 }
   0x3   :  { %13 = vsyncpa [#allocation6 + $0x1], 0  ;;  %s1119_s21 = smov 0   ;;  %s1121_s22 = smov 0  }
   0x4   :  { %s1123_s23 = smov 0   ;;  %s1125_s24 = smov 0  }
   0x5   :  { %s1127_s25 = smov 0   ;;  %s1129_s26 = smov 0  }
   0x6   :  { %s1131_s27 = smov 0   ;;  %s1133_s28 = smov 0  }
   0x7   :  { %s1135_s29 = smov 0   ;;  %s1137_s30 = smov 0  }
   0x8 LB: > { %1437 = sst [smem:[#allocation8_spill]] %s1069_s28  ;;  %s787_s7 = sadd.s32 4294967295, %s1077_s30   ;;  %s1077_s30 = sphi %s1137_s30, %s19_s30   ;;  %s1073_s29 = sphi %s1135_s29, %s1449_s29   ;;  %s1069_s28 = sphi %s1133_s28, %s1448_s28   ;;  %s1065_s27 = sphi %s1131_s27, %s1447_s27   ;;  %s1061_s26 = sphi %s1129_s26, %s1446_s26   ;;  %s1057_s25 = sphi %s1127_s25, %s1454_s25   ;;  %s1053_s24 = sphi %s1125_s24, %s1453_s24   ;;  %s1049_s23 = sphi %s1123_s23, %s1452_s23   ;;  %s1045_s22 = sphi %s1121_s22, %s1451_s22   ;;  %s1041_s21 = sphi %s1119_s21, %s1450_s21  }
   0x9   : > { %1438 = sst [smem:[#allocation9_spill]] %s1073_s29  ;;  %s788_s8 = sadd.s32 4294967294, %s1077_s30  }
   0xa   : > { %s28_s9 = sadd.s32 1, %s1069_s28  ;;  %s31_s10 = sadd.s32 1, %s1073_s29 }
   0xb   : > { %p29_p0 = scmp.ge.s32.totalorder %s28_s9, 2  ;;  %s85_s11 = sadd.s32 1, %s1057_s25 }
   0xc   : > { %p92_p1 = scmp.ne.s32.totalorder %s1057_s25, %s1053_s24  ;;  %p93_p2 = scmp.eq.s32.totalorder %s1077_s30, 0 }
   0xd   : > { %s1456_s9 = smov (%p29_p0, %s28_s9), 0  ;;  %s1458_s10 = smov (!%p29_p0, %s31_s10), %s1073_s29 }
   0xe   : > { %1439 = sst [smem:[#allocation10_spill]] %s1456_s9  ;;  %s82_s12 = ssub.s32 %s1069_s28, %s1456_s9 }
   0xf   : > { %p1182_p3 = por %p93_p2, %p92_p1  ;;  %p33_p4 = scmp.ge.s32.totalorder %s1458_s10, 3 }
  0x10   : > { %p83_p5 = scmp.eq.s32.totalorder %s82_s12, 0  ;;  %s179_s14 = sadd.s32 1, %s1049_s23 }
  0x11   : > { %p189_p6 = scmp.ne.s32.totalorder %s1049_s23, %s1045_s22  ;;  %s1460_s10 = smov (%p33_p4, %s1458_s10), 0 }
  0x12   : > { %1441 = sst [smem:[#allocation11_spill]] %s1460_s10  ;;  %s176_s16 = ssub.s32 %s1073_s29, %s1460_s10 }
  0x13   : > { %s1192_s15 = scalar_select %p83_p5, %s1057_s25, %s85_s11  }
  0x14   : > { %p190_p7 = scmp.eq.s32.totalorder %s787_s7, 5  ;;  %p177_p8 = scmp.eq.s32.totalorder %s176_s16, 0 }
  0x15   : > { %p195_p9 = scmp.ne.s32.totalorder %s1045_s22, %s1041_s21  ;;  %p196_p11 = scmp.eq.s32.totalorder %s788_s8, 5 }
  0x16   : > { %p1198_p10 = por %p190_p7, %p189_p6  ;;  %p790_p13 = scmp.ge.s32.totalorder %s1077_s30, 6 }
  0x17   : > { %s1203_s18 = scalar_select %p177_p8, %s1049_s23, %s179_s14  }
  0x18   : > { %p1205_p12 = por %p196_p11, %p195_p9  ;;  %221 = sbr.rel (%p790_p13) target bundleno = 51 (0x33), region = 28 }
  0x1d   : > { %233 = sbr.rel (!%p1182_p3) target bundleno = 51 (0x33), region = 36  ;;  %s235_s20 = sand.u32 (%p1182_p3), 1, %s1057_s25  }
  0x1e   : > { %s812_s7 = sshll.u32 (%p1182_p3), %s1069_s28, 4  ;;  %s868_s11 = smul.u32 (%p1182_p3), 192, %s235_s20 }
  0x1f   : > { %s1444_s2 = sld [smem:[#allocation12_spill]] (%p1182_p3) }
  0x20   : > { %s1225_s13 = scalar_lea.vmem (%p1182_p3), [#allocation4], %s868_s11 }
  0x25   : > { %s1217_s8 = scalar_lea.vmem %s1444_s2, %s812_s7 }
  0x26   : > { %v253_v0 = vld [vmem:[%s1217_s8] sm:$0xff]  ;;  %v255_v1 = vld [vmem:[%s1217_s8 + $0x8] sm:$0xff] }
  0x27   : > { %v257_v2 = vld [vmem:[%s1217_s8 + $0x20] sm:$0xff]  ;;  %v259_v3 = vld [vmem:[%s1217_s8 + $0x28] sm:$0xff]  ;;  %254 = vst [vmem:[%s1225_s13] sm:$0xff] %v253_v0  ;;  %256 = vst [vmem:[%s1225_s13 + $0x8] sm:$0xff] %v255_v1 }
  0x28   : > { %v261_v4 = vld [vmem:[%s1217_s8 + $0x40] sm:$0xff]  ;;  %v263_v5 = vld [vmem:[%s1217_s8 + $0x48] sm:$0xff]  ;;  %258 = vst [vmem:[%s1225_s13 + $0x10] sm:$0xff] %v257_v2  ;;  %260 = vst [vmem:[%s1225_s13 + $0x18] sm:$0xff] %v259_v3 }
  0x29   : > { %262 = vst [vmem:[%s1225_s13 + $0x20] sm:$0xff] %v261_v4  ;;  %264 = vst [vmem:[%s1225_s13 + $0x28] sm:$0xff] %v263_v5  ;;  %v265_v6 = vld [vmem:[%s1217_s8 + $0x60] sm:$0xff]  ;;  %v267_v7 = vld [vmem:[%s1217_s8 + $0x68] sm:$0xff] }
  0x2a   : > { %v269_v8 = vld [vmem:[%s1217_s8 + $0x80] sm:$0xff]  ;;  %266 = vst [vmem:[%s1225_s13 + $0x30] sm:$0xff] %v265_v6  ;;  %268 = vst [vmem:[%s1225_s13 + $0x38] sm:$0xff] %v267_v7  ;;  %v271_v9 = vld [vmem:[%s1217_s8 + $0x88] sm:$0xff] }
  0x2b   : > { %270 = vst [vmem:[%s1225_s13 + $0x40] sm:$0xff] %v269_v8  ;;  %v273_v10 = vld [vmem:[%s1217_s8 + $0xa0] sm:$0xff]  ;;  %v275_v11 = vld [vmem:[%s1217_s8 + $0xa8] sm:$0xff]  ;;  %272 = vst [vmem:[%s1225_s13 + $0x48] sm:$0xff] %v271_v9 }
  0x2c   : > { %274 = vst [vmem:[%s1225_s13 + $0x50] sm:$0xff] %v273_v10  ;;  %276 = vst [vmem:[%s1225_s13 + $0x58] sm:$0xff] %v275_v11  ;;  %v277_v12 = vld [vmem:[%s1217_s8 + $0xc0] sm:$0xff]  ;;  %v279_v13 = vld [vmem:[%s1217_s8 + $0xc8] sm:$0xff] }
  0x2d   : > { %v281_v14 = vld [vmem:[%s1217_s8 + $0xe0] sm:$0xff]  ;;  %278 = vst [vmem:[%s1225_s13 + $0x60] sm:$0xff] %v277_v12  ;;  %280 = vst [vmem:[%s1225_s13 + $0x68] sm:$0xff] %v279_v13  ;;  %v283_v15 = vld [vmem:[%s1217_s8 + $0xe8] sm:$0xff] }
  0x2e   : > { %282 = vst [vmem:[%s1225_s13 + $0x70] sm:$0xff] %v281_v14  ;;  %v285_v16 = vld [vmem:[%s1217_s8 + $0x100] sm:$0xff]  ;;  %v287_v17 = vld [vmem:[%s1217_s8 + $0x108] sm:$0xff]  ;;  %284 = vst [vmem:[%s1225_s13 + $0x78] sm:$0xff] %v283_v15 }
  0x2f   : > { %286 = vst [vmem:[%s1225_s13 + $0x80] sm:$0xff] %v285_v16  ;;  %288 = vst [vmem:[%s1225_s13 + $0x88] sm:$0xff] %v287_v17  ;;  %v289_v18 = vld [vmem:[%s1217_s8 + $0x120] sm:$0xff]  ;;  %v291_v19 = vld [vmem:[%s1217_s8 + $0x128] sm:$0xff] }
  0x30   : > { %v293_v20 = vld [vmem:[%s1217_s8 + $0x140] sm:$0xff]  ;;  %290 = vst [vmem:[%s1225_s13 + $0x90] sm:$0xff] %v289_v18  ;;  %292 = vst [vmem:[%s1225_s13 + $0x98] sm:$0xff] %v291_v19  ;;  %v295_v21 = vld [vmem:[%s1217_s8 + $0x148] sm:$0xff] }
  0x31   : > { %294 = vst [vmem:[%s1225_s13 + $0xa0] sm:$0xff] %v293_v20  ;;  %v297_v22 = vld [vmem:[%s1217_s8 + $0x160] sm:$0xff]  ;;  %v299_v23 = vld [vmem:[%s1217_s8 + $0x168] sm:$0xff]  ;;  %296 = vst [vmem:[%s1225_s13 + $0xa8] sm:$0xff] %v295_v21 }
  0x32   : > { %298 = vst [vmem:[%s1225_s13 + $0xb0] sm:$0xff] %v297_v22  ;;  %300 = vst [vmem:[%s1225_s13 + $0xb8] sm:$0xff] %v299_v23 }
  0x33 PF: > { %p793_p0 = scmp.ge.s32.totalorder %s1077_s30, 1  ;;  %p314_p1 = scmp.lt.s32.totalorder %s1077_s30, 7 }
  0x35   : > { %p315_p2 = pnand %p793_p0, %p314_p1 }
  0x36   : > { %s321_s14 = sand.u32 (!%p315_p2), 1, %s1053_s24   ;;  %s1435_s20 = sand.u32 (!%p315_p2), 1, %s1045_s22  }
  0x37   : > { %318 = sbr.rel (%p315_p2) target bundleno = 718 (0x2ce), region = 63  ;;  %s794_s11 = sshll.u32 (!%p315_p2), %s1435_s20, 4 }
  0x38   : > { %s869_s7 = smul.u32 (!%p315_p2), 192, %s321_s14  ;;  %s795_s12 = sshll.u32 (!%p315_p2), %s1065_s27, 1 }
  0x39   : > { %p361_p3 = scmp.lt.s32.totalorder (!%p315_p2), %s795_s12, 5  ;;  %s797_s16 = sshll.u32 (!%p315_p2), %s1061_s26, 4 }
  0x3a   : > { %p368_p4 = scmp.lt.s32.totalorder (!%p315_p2), %s797_s16, 31  ;;  %s1285_s14 = scalar_lea.vmem (!%p315_p2), [#allocation4], %s869_s7 }
  0x3b   : > { %s1287_s20 = scalar_lea.vmem (!%p315_p2), [#allocation5], %s794_s11  ;;  %p799_p5 = scmp.ne.s32.totalorder (!%p315_p2), %s1061_s26, 0 }
  0x3c   : > { %s1462_s12 = smov (!%p361_p3, %s795_s12), 5  ;;  %s1464_s16 = smov (!%p368_p4, %s797_s16), 31 }
  0x3d   : > { %s796_s8 = sshll.u32 %s1462_s12, 3  ;;  %s798_s9 = sshll.u32 %s1464_s16, 3 }
  0x3e   : > { %s364_s10 = scalar_lea.vmem %s1424_s0, %s796_s8  ;;  %s1283_s24 = scalar_lea.vmem %s1428_s4, %s798_s9 }
  0x3f   : > { %377 = sbr.rel (%p799_p5) target bundleno = 237 (0xed), region = 71 }
  0x44   : > { %v378_v24 = vld [vmem:[%s364_s10] sm:$0xff]  ;;  %vm382_vm0 = vcmask 785408   ;;  %v379_v25 = vld [vmem:[%s364_s10 + $0x8] sm:$0xff]  ;;  %v1079_v27 = vmov 0.0  }
  0x45   : > { %v380_v26 = vmul.f32 %v378_v24, %v378_v24  ;;  %409 = vst.msk [vmem:[#allocation3] sm:$0xff] %vm382_vm0, %v1079_v27  ;;  %410 = vst.msk [vmem:[#allocation3 + $0x8] sm:$0xff] %vm382_vm0, %v1079_v27  ;;  %v381_v28 = vmul.f32 %v379_v25, %v379_v25  ;;  %v800_v38 = vld [vmem:[%s1425_s1] ss:$0 sm:$0xff] }
  0x47   : > { %v383_v29 = vsel %vm382_vm0, %v380_v26, 0.0  ;;  %v386_v30 = vsel %vm382_vm0, %v381_v28, 0.0 }
  0x48   : > { %384 = vadd.xlane.f32.xlu0 %v383_v29 }
  0x4c   : > { %387 = vadd.xlane.f32.xlu0 %v386_v30 }
  0xd1   : > { %v385_v31 = vpop.xlane.xlu0 %384 }
  0xd2   : > { %v390_v32 = vmul.f32 0.010416667, %v385_v31 }
  0xd4   : > { %v392_v33 = vadd.f32 1.1920929e-07, %v390_v32 }
  0xd5   : > { %v388_v34 = vpop.xlane.xlu0 %387 }
  0xd6   : > { %961 = vrsqrt.f32 %v392_v33  ;;  %v391_v35 = vmul.f32 0.010416667, %v388_v34 }
  0xd8   : > { %v393_v36 = vadd.f32 1.1920929e-07, %v391_v35 }
  0xda   : > { %963 = vrsqrt.f32 %v393_v36 }
  0xe3   : > { %v962_v37 = vpop.eup %961 }
  0xe4   : > { %v396_v39 = vmul.f32 %v962_v37, %v378_v24 }
  0xe6   : > { %v405_v40 = vmul.f32 %v800_v38, %v396_v39 }
  0xe7   : > { %v964_v41 = vpop.eup %963 }
  0xe8   : > { %407 = vst.msk [vmem:[#allocation2] sm:$0xff] %vm382_vm0, %v405_v40  ;;  %v397_v42 = vmul.f32 %v964_v41, %v379_v25 }
  0xea   : > { %v406_v43 = vmul.f32 %v800_v38, %v397_v42 }
  0xec   : > { %408 = vst.msk [vmem:[#allocation2 + $0x8] sm:$0xff] %vm382_vm0, %v406_v43 }
  0xed PF: > { %v436_v44 = vld [vmem:[%s1285_s14 + $0xb8] sm:$0xff]  ;;  %v435_v45 = vld [vmem:[%s1285_s14 + $0xb0] sm:$0xff]  ;;  %v434_v46 = vld [vmem:[%s1285_s14 + $0xa8] sm:$0xff]  ;;  %v1080_v48 = vmov 0.0   ;;  %vm457_vm1 = vcmask 785408   ;;  %s437_s29 = sshra.s32 %s1061_s26, 1  ;;  %v447_v23 = vlaneseq }
  0xee   : > { %472 = vmatprep.subr.mxu0 %v436_v44  ;;  %v433_v47 = vld [vmem:[%s1285_s14 + $0xa0] sm:$0xff]  ;;  %528 = vmatprep.mubr.f32.mxu0 %v1080_v48  ;;  %v432_v49 = vld [vmem:[%s1285_s14 + $0x98] sm:$0xff]  ;;  %v431_v50 = vld [vmem:[%s1285_s14 + $0x90] sm:$0xff]  ;;  %s440_s9 = sand.u32 1, %s1061_s26  ;;  %s813_s10 = sshll.u32 %s437_s29, 2 }
  0xef   : > { %473 = vmatpush1.msra.mxu0 %v435_v45  ;;  %v430_v51 = vld [vmem:[%s1285_s14 + $0x88] sm:$0xff]  ;;  %v429_v52 = vld [vmem:[%s1285_s14 + $0x80] sm:$0xff]  ;;  %v428_v53 = vld [vmem:[%s1285_s14 + $0x78] sm:$0xff]  ;;  %s443_s7 = sadd.s32 %s813_s10, %s440_s9  ;;  %v448_v24 = vshrl.u32 %v447_v23, 7  ;;  %p805_p6 = scmp.ne.s32.totalorder %s1061_s26, 1 }
  0xf0   : > { %474 = vmatprep.subr.mxu0 %v434_v46  ;;  %v427_v54 = vld [vmem:[%s1285_s14 + $0x70] sm:$0xff]  ;;  %v426_v55 = vld [vmem:[%s1285_s14 + $0x68] sm:$0xff]  ;;  %v570_v56 = vld [vmem:[%s1283_s24 + $0x78] sm:$0xff]  ;;  %s444_s16 = scalar_lea.vmem %s1427_s3, %s443_s7 }
  0xf1   : > { %475 = vmatpush1.msra.mxu0 %v433_v47  ;;  %v425_v57 = vld [vmem:[%s1285_s14 + $0x60] sm:$0xff]  ;;  %833 = vmatprep.subr.mxu1 %v570_v56  ;;  %v424_v58 = vld [vmem:[%s1285_s14 + $0x58] sm:$0xff]  ;;  %v423_v59 = vld [vmem:[%s1285_s14 + $0x50] sm:$0xff]  ;;  %v453_v25 = vsub.s32 1, %v448_v24  ;;  %v449_v36 = vsub.s32 0, %v448_v24 }
  0xf2   : > { %476 = vmatprep.subr.mxu0 %v432_v49  ;;  %834 = vmatpush3.msra.mxu1 %v570_v56  ;;  %v422_v60 = vld [vmem:[%s1285_s14 + $0x48] sm:$0xff]  ;;  %v421_v61 = vld [vmem:[%s1285_s14 + $0x40] sm:$0xff]  ;;  %v420_v62 = vld [vmem:[%s1285_s14 + $0x38] sm:$0xff] }
  0xf3   : > { %477 = vmatpush1.msra.mxu0 %v431_v50  ;;  %v419_v63 = vld [vmem:[%s1285_s14 + $0x30] sm:$0xff]  ;;  %v418_v0 = vld [vmem:[%s1285_s14 + $0x28] sm:$0xff]  ;;  %v417_v1 = vld [vmem:[%s1285_s14 + $0x20] sm:$0xff] }
  0xf4   : > { %478 = vmatprep.subr.mxu0 %v430_v51  ;;  %v416_v2 = vld [vmem:[%s1285_s14 + $0x18] sm:$0xff]  ;;  %v415_v3 = vld [vmem:[%s1285_s14 + $0x10] sm:$0xff]  ;;  %v414_v4 = vld [vmem:[%s1285_s14 + $0x8] sm:$0xff] }
  0xf5   : > { %479 = vmatpush1.msra.mxu0 %v429_v52  ;;  %v413_v5 = vld [vmem:[%s1285_s14] sm:$0xff]  ;;  %v412_v7 = vld [vmem:[#allocation2 + $0x8] sm:$0xff]  ;;  %v569_v8 = vld [vmem:[%s1283_s24 + $0x70] sm:$0xff] }
  0xf6   : > { %480 = vmatprep.subr.mxu0 %v428_v53  ;;  %v411_v6 = vld [vmem:[#allocation2] sm:$0xff]  ;;  %835 = vmatprep.subr.mxu1 %v569_v8  ;;  %v568_v9 = vld [vmem:[%s1283_s24 + $0x68] sm:$0xff]  ;;  %v566_v11 = vld [vmem:[%s1283_s24 + $0x58] sm:$0xff] }
  0xf7   : > { %481 = vmatpush1.msra.mxu0 %v427_v54  ;;  %836 = vmatpush3.msra.mxu1 %v569_v8  ;;  %v567_v10 = vld [vmem:[%s1283_s24 + $0x60] sm:$0xff]  ;;  %v565_v12 = vld [vmem:[%s1283_s24 + $0x50] sm:$0xff]  ;;  %v564_v13 = vld [vmem:[%s1283_s24 + $0x48] sm:$0xff] }
  0xf8   : > { %482 = vmatprep.subr.mxu0 %v426_v55  ;;  %837 = vmatprep.subr.mxu1 %v568_v9  ;;  %v563_v14 = vld [vmem:[%s1283_s24 + $0x40] sm:$0xff]  ;;  %v562_v15 = vld [vmem:[%s1283_s24 + $0x38] sm:$0xff]  ;;  %v561_v16 = vld [vmem:[%s1283_s24 + $0x30] sm:$0xff] }
  0xf9   : > { %483 = vmatpush1.msra.mxu0 %v425_v57  ;;  %838 = vmatpush3.msra.mxu1 %v568_v9  ;;  %v560_v17 = vld [vmem:[%s1283_s24 + $0x28] sm:$0xff]  ;;  %v559_v18 = vld [vmem:[%s1283_s24 + $0x20] sm:$0xff]  ;;  %v558_v19 = vld [vmem:[%s1283_s24 + $0x18] sm:$0xff] }
  0xfa   : > { %484 = vmatprep.subr.mxu0 %v424_v58  ;;  %839 = vmatprep.subr.mxu1 %v567_v10  ;;  %v557_v20 = vld [vmem:[%s1283_s24 + $0x10] sm:$0xff]  ;;  %v556_v21 = vld [vmem:[%s1283_s24 + $0x8] sm:$0xff]  ;;  %v555_v22 = vld [vmem:[%s1283_s24] sm:$0xff] }
  0xfb   : > { %485 = vmatpush1.msra.mxu0 %v423_v59  ;;  %840 = vmatpush3.msra.mxu1 %v567_v10  ;;  %v445_v26 = vld [vmem:[%s444_s16] ss:$2 sm:$0x3]  ;;  %v554_v50 = vld [vmem:[#allocation3 + $0x8] sm:$0xff]  ;;  %v553_v52 = vld [vmem:[#allocation3] sm:$0xff] }
  0xfc   : > { %486 = vmatprep.subr.mxu0 %v422_v60  ;;  %841 = vmatprep.subr.mxu1 %v566_v11  ;;  %v454_v27 = vrot.slane %v445_v26, %v453_v25  ;;  %v450_v37 = vrot.slane %v445_v26, %v449_v36 }
  0xfd   : > { %487 = vmatpush1.msra.mxu0 %v421_v61  ;;  %842 = vmatpush3.msra.mxu1 %v566_v11 }
  0xfe   : > { %488 = vmatprep.subr.mxu0 %v420_v62  ;;  %843 = vmatprep.subr.mxu1 %v565_v12 }
  0xff   : > { %489 = vmatpush1.msra.mxu0 %v419_v63  ;;  %844 = vmatpush3.msra.mxu1 %v565_v12 }
 0x100   : > { %490 = vmatprep.subr.mxu0 %v418_v0  ;;  %845 = vmatprep.subr.mxu1 %v564_v13 }
 0x101   : > { %491 = vmatpush1.msra.mxu0 %v417_v1  ;;  %846 = vmatpush3.msra.mxu1 %v564_v13 }
 0x102   : > { %492 = vmatprep.subr.mxu0 %v416_v2  ;;  %847 = vmatprep.subr.mxu1 %v563_v14 }
 0x103   : > { %493 = vmatpush1.msra.mxu0 %v415_v3  ;;  %848 = vmatpush3.msra.mxu1 %v563_v14 }
 0x104   : > { %494 = vmatprep.subr.mxu0 %v414_v4  ;;  %849 = vmatprep.subr.mxu1 %v562_v15 }
 0x105   : > { %495 = vmatpush1.msra.mxu0 %v413_v5  ;;  %850 = vmatpush3.msra.mxu1 %v562_v15 }
 0x106   : > { %803 = vmatmul.mubr.msk.f32.vlgmr.msra.gmra.mxu0 %vm457_vm1, %v411_v6  ;;  %851 = vmatprep.subr.mxu1 %v561_v16 }
 0x107   : > { %534 = vmatprep.mubr.f32.mxu0 %v1080_v48  ;;  %852 = vmatpush3.msra.mxu1 %v561_v16 }
 0x108   : > { %853 = vmatprep.subr.mxu1 %v560_v17 }
 0x109   : > { %854 = vmatpush3.msra.mxu1 %v560_v17 }
 0x10a   : > { %804 = vmatmul.mubr.msk.f32.gmra.mxu0 %vm457_vm1, %v412_v7  ;;  %855 = vmatprep.subr.mxu1 %v559_v18 }
 0x10b   : > { %856 = vmatpush3.msra.mxu1 %v559_v18 }
 0x10c   : > { %857 = vmatprep.subr.mxu1 %v558_v19 }
 0x10d   : > { %858 = vmatpush3.msra.mxu1 %v558_v19 }
 0x10e   : > { %859 = vmatprep.subr.mxu1 %v557_v20 }
 0x10f   : > { %860 = vmatpush3.msra.mxu1 %v557_v20 }
 0x110   : > { %861 = vmatprep.subr.mxu1 %v556_v21 }
 0x111   : > { %862 = vmatpush3.msra.mxu1 %v556_v21 }
 0x112   : > { %863 = vmatprep.subr.mxu1 %v555_v22 }
 0x113   : > { %864 = vmatpush3.msra.mxu1 %v555_v22 }
 0x1c6   : > { %v530_v28 = vpop.f32.mrf.mxu0 }
 0x1c7   : > { %v531_v41 = vadd.f32 %v530_v28, %v450_v37 }
 0x1c8   : > { %v532_v29 = vpop.f32.mrf.mxu0 }
 0x1c9   : > { %v533_v30 = vadd.f32 %v532_v29, %v454_v27 }
 0x1ca   : > { %v536_v31 = vpop.f32.mrf.mxu0 }
 0x1cb   : > { %v543_v32 = vmul.f32 0.70710677, %v533_v30  ;;  %v541_v39 = vmul.f32 0.5, %v533_v30  ;;  %v537_v47 = vadd.f32 %v536_v31, %v450_v37 }
 0x1cc   : > { %v538_v33 = vpop.f32.mrf.mxu0 }
 0x1cd   : > { %965 = verf.f32 %v543_v32  ;;  %v539_v34 = vadd.f32 %v538_v33, %v454_v27 }
 0x1cf   : > { %v544_v35 = vmul.f32 0.70710677, %v539_v34  ;;  %v542_v44 = vmul.f32 0.5, %v539_v34 }
 0x1d1   : > { %967 = verf.f32 %v544_v35 }
 0x1da   : > { %v966_v38 = vpop.eup %965 }
 0x1db   : > { %v547_v40 = vadd.f32 1.0, %v966_v38 }
 0x1dd   : > { %v549_v42 = vmul.f32 %v547_v40, %v541_v39 }
 0x1de   : > { %v968_v43 = vpop.eup %967 }
 0x1df   : > { %v548_v45 = vadd.f32 1.0, %v968_v43  ;;  %v551_v46 = vmul.f32 %v549_v42, %v531_v41 }
 0x1e1   : > { %v550_v48 = vmul.f32 %v548_v45, %v542_v44  ;;  %865 = vmatprep.mubr.f32.mxu1 %v551_v46 }
 0x1e3   : > { %v552_v49 = vmul.f32 %v550_v48, %v537_v47 }
 0x1e5   : > { %866 = vmatmul.mubr.f32.vlgmr.msra.gmra.mxu1 %v552_v49 }
 0x2a5   : > { %v867_v51 = vpop.f32.mrf.mxu1 }
 0x2a6   : > { %v647_v53 = vadd.f32 %v867_v51, %v554_v50  ;;  %653 = sbr.rel (%p805_p6) target bundleno = 693 (0x2b5), region = 75 }
 0x2a7   : > { %v637_v54 = vpop.f32.mrf.mxu1 }
 0x2a8   : > { %649 = vst.msk [vmem:[#allocation3 + $0x8] sm:$0xff] %vm457_vm1, %v647_v53  ;;  %v646_v55 = vadd.f32 %v637_v54, %v553_v52 }
 0x2aa   : > { %648 = vst.msk [vmem:[#allocation3] sm:$0xff] %vm457_vm1, %v646_v55 }
 0x2ab   : > { %v806_v57 = vld [vmem:[%s1429_s5] ss:$0 sm:$0xff] }
 0x2af   : > { %v655_v58 = vld [vmem:[#allocation3 + $0x8] sm:$0xff] }
 0x2b0   : > { %v664_v60 = vadd.f32 %v806_v57, %v655_v58 }
 0x2b1   : > { %v654_v56 = vld [vmem:[#allocation3] sm:$0xff] }
 0x2b2   : > { %v663_v59 = vadd.f32 %v806_v57, %v654_v56  ;;  %666 = vst.msk [vmem:[%s1287_s20 + $0x8] sm:$0xff] %vm457_vm1, %v664_v60 }
 0x2b4   : > { %665 = vst.msk [vmem:[%s1287_s20] sm:$0xff] %vm457_vm1, %v663_v59 }
 0x2b5 PF: > { %s814_s26 = sshll.u32 %s1065_s27, 8  ;;  %s681_s28 = sshll.u32 %s1287_s20, 4  ;;  %s1363_s28 = int_to_ptr.vmem [resolvable:$true] %s681_s28 }
 0x2b6   : > { %s1360_s2 = scalar_lea.hbm %s1430_s6, %s814_s26  ;;  %s1445_s29 = sand.u32 1, %s1045_s22  }
 0x2b7   : > { %s1367_s9 = scalar_lea.sflag [#allocation6], %s1445_s29  ;;  %s969_s10 = scalar_lea.vmem %s1363_s28, 256 }
 0x2b8   : > { %p970_p7 = scmp.ne.s32.totalorder %s1363_s28, %s969_s10  ;;  %s1081_s27 = smov [#allocation5]  }
 0x2b9   : > { %s973_s7 = sshll.u32 %s1081_s27, 4  ;;  %s974_s7 = int_to_ptr.vmem [resolvable:$false] %s973_s7 }
 0x2ba   : > { %p971_p8 = pnand %p970_p7, %p1198_p10  ;;  %s975_s11 = scalar_lea.vmem %s974_s7, 512 }
 0x2bb   : > { %p976_p11 = scmp.lt.s32.totalorder %s1363_s28, %s974_s7  ;;  %p977_p13 = scmp.lt.s32.totalorder %s975_s11, %s969_s10 }
 0x2bc   : > { %p972_p9 = pneg %p971_p8 }
 0x2bd   : > { %p978_p0 = por %p977_p13, %p976_p11 }
 0x2bf   : > { %p979_p1 = pnand %p978_p0, %p972_p9 }
 0x2c1   : > { %982 = shalt.err (!%p979_p1)
}
 0x2c2   : > { %s983_s20 = scalar_lea.hbm %s1360_s2, 256  ;;  %s987_s8 = scalar_lea.hbm %s1430_s6, 768 }
 0x2c3   : > { %p984_p2 = scmp.ne.s32.totalorder %s1360_s2, %s983_s20  ;;  %p988_p5 = scmp.lt.s32.totalorder %s1360_s2, %s1430_s6 }
 0x2c4   : > { %p989_p6 = scmp.lt.s32.totalorder %s987_s8, %s983_s20 }
 0x2c5   : > { %p985_p3 = pnand %p984_p2, %p1198_p10 }
 0x2c6   : > { %p990_p7 = por %p989_p6, %p988_p5 }
 0x2c7   : > { %p986_p4 = pneg %p985_p3 }
 0x2c9   : > { %p991_p8 = pnand %p990_p7, %p986_p4 }
 0x2cb   : > { %994 = shalt.err (!%p991_p8)
}
 0x2cc   : > { %s1082_s24 = smov 128   ;;  %s1083_s14 = smov 8  }
 0x2cd   : > { %870 = dma.vmem_to_hbm [thread:$0]  (%p1198_p10), %s1363_s28, 256, %s1360_s2, %s1367_s9, %s1082_s24, %s1082_s24, %s1083_s14  }
 0x2ce PF: > { %p876_p9 = scmp.ge.s32.totalorder %s1077_s30, 2  ;;  %s696_s29 = sand.u32 1, %s1041_s21  }
 0x2cf   : > { %s697_s10 = scalar_lea.sflag [#allocation6], %s696_s29 }
 0x2d0   : > { %p873_p11 = pnand %p876_p9, %p1205_p12 }
 0x2d2   : > { %p874_p13 = pneg %p873_p11 }
 0x2d4   : > { %1036 = dma.done.wait (%p874_p13), %s697_s10, 256  }
 0x2d5   : > { %1038 = vsyncadd (%p874_p13), %s697_s10, 4294967040  ;;  %s19_s30 = sadd.s32 1, %s1077_s30   ;;  %s1446_s26 = sld [smem:[#allocation8_spill]] }
 0x2d6   : > { %p16_p0 = scmp.ge.s32.totalorder %s19_s30, 8   ;;  %s1447_s27 = sld [smem:[#allocation9_spill]] }
 0x2d7   : > { %s1448_s28 = sld [smem:[#allocation10_spill]]  ;;  %s1450_s21 = smov %s1045_s22 }
 0x2d8   : > { %s1449_s29 = sld [smem:[#allocation11_spill]]  ;;  %s1451_s22 = smov %s1049_s23 }
 0x2d9   : > { %s1452_s23 = smov %s1203_s18  ;;  %s1453_s24 = smov %s1057_s25 }
 0x2da   : > { %s1454_s25 = smov %s1192_s15  ;;  %18 = sbr.rel (!%p16_p0) target bundleno = 8 (0x8), region = 122 }
 0x2df   :  { %702 = vsyncpa [#allocation6], 1 }
 0x2e0   :  { %704 = vsyncpa [#allocation6 + $0x1], 1 }

</bundles_post_ra>
